<compile_context>
chip_gen: v7x
topology: tpu7x:2x2x1
jax: 0.10.0
libtpu: 0.0.40
codegen_flags: <defaults>
</compile_context>

<pallas_src>
import functools

import jax
import jax.numpy as jnp
from jax.experimental import pallas as pl
from jax.experimental.pallas import tpu as pltpu


def _cdiv(a, b):
    return -(-a // b)


def _round_up(a, b):
    return _cdiv(a, b) * b


def _pad_channels_kernel(x_ref, o_ref, *, pad):
    """Channel zero-pad of one batch tile.

    x_ref: (TB, C,         S)   subsampled activations, S = H_out*W_out (lanes)
    o_ref: (TB, C + 2*pad, S)   zeros / data / zeros along the channel (sublane) axis

    Three direct sub-ref stores; no in-register concatenate, lane dim full width.
    """
    tb, c, s = x_ref.shape
    x = x_ref[...]
    if x.dtype != o_ref.dtype:
        x = x.astype(o_ref.dtype)
    if pad == 0:
        o_ref[...] = x
    else:
        zeros = jnp.zeros((tb, pad, s), dtype=o_ref.dtype)
        o_ref[:, :pad, :] = zeros
        o_ref[:, pad:pad + c, :] = x
        o_ref[:, pad + c:, :] = zeros


def _vmem_capacity_bytes():
    """Physical VMEM of the current chip; conservative fallback = 64 MiB (v7x)."""
    try:
        return int(pltpu.get_tpu_info().vmem_capacity_bytes)
    except Exception:
        return 64 * 1024 * 1024


def _block_bytes(c, s, itemsize):
    """VMEM footprint of one (1, c, s) block after (8, 128) tile padding."""
    return _round_up(c, 8) * _round_up(s, 128) * itemsize


def _pick_batch_tile(n, per_batch_bytes, vmem_limit_bytes):
    """Largest batch tile whose double-buffered in+out blocks stay well inside
    the requested scoped-VMEM limit.  Prefers an even step count so v7x's two
    TensorCores get balanced work under dimension_semantics=('parallel',);
    no minimum step count is imposed (single-TC v5e/v6e gains nothing from it)."""
    budget = vmem_limit_bytes // 4      # in+out per block; x2 double-buffering ~= half the limit
    tb = max(1, min(n, budget // max(per_batch_bytes, 1)))
    steps = _cdiv(n, tb)
    if steps > 1 and steps % 2 == 1:
        steps += 1                      # best-effort even grid (exactness not always possible)
        tb = _cdiv(n, steps)
    return tb


def pallas_option_a_shortcut(x, planes):
    """NCHW x -> F.pad(x[:, :, ::2, ::2], (0,0,0,0, planes//4, planes//4))."""
    n, c, h, w = x.shape
    pad = planes // 4
    c_out = c + 2 * pad

    # Stride-2 spatial subsample.  Kept as an XLA strided slice (matches the
    # PyTorch ::2 exactly, incl. odd H/W) but fused into the pallas_call
    # operand via allow_input_fusion so no quarter-size intermediate is
    # materialized in HBM.
    x_sub = x[:, :, ::2, ::2]
    h_out, w_out = x_sub.shape[2], x_sub.shape[3]
    s = h_out * w_out

    # Lane-dense layout: spatial pixels flattened onto the lane axis, channels
    # on sublanes, batch as the untiled leading dim.  Free row-major reshape.
    x_k = x_sub.reshape(n, c, s)

    itemsize = jnp.dtype(x.dtype).itemsize
    vmem_cap = _vmem_capacity_bytes()
    vmem_limit = min(vmem_cap // 2, 64 * 1024 * 1024)   # 64 MiB v5e/v6e, 32 MiB v7x
    per_batch_bytes = (_block_bytes(c, s, itemsize)
                       + _block_bytes(c_out, s, itemsize))
    tb = _pick_batch_tile(n, per_batch_bytes, vmem_limit)
    grid = (_cdiv(n, tb),)

    bytes_accessed = (n * c * s + n * c_out * s) * itemsize

    out_k = pl.pallas_call(
        functools.partial(_pad_channels_kernel, pad=pad),
        out_shape=jax.ShapeDtypeStruct((n, c_out, s), x.dtype),
        grid=grid,
        in_specs=[pl.BlockSpec((tb, c, s), lambda i: (i, 0, 0))],
        out_specs=pl.BlockSpec((tb, c_out, s), lambda i: (i, 0, 0)),
        compiler_params=pltpu.CompilerParams(
            dimension_semantics=("parallel",),
            vmem_limit_bytes=vmem_limit,
            allow_input_fusion=[True],
        ),
        cost_estimate=pl.CostEstimate(
            flops=0, transcendentals=0, bytes_accessed=bytes_accessed),
    )(x_k)

    # Free reshape back to NCHW-shaped output.
    return out_k.reshape(n, c_out, h_out, w_out)


class LambdaLayer:
    """JAX mirror of the PyTorch LambdaLayer: forward(x) = lambd(x)."""

    def __init__(self, lambd):
        self.lambd = lambd

    def __call__(self, x):
        return self.lambd(x)


if __name__ == "__main__":
    key = jax.random.PRNGKey(0)

    # Small shapes consistent with the ResNet-CIFAR usage: NCHW.
    N, C, H, W = 2, 4, 16, 16
    planes = 2 * C                      # the usual "option A" doubling
    x = jax.random.normal(key, (N, C, H, W), dtype=jnp.float32)

    layer = LambdaLayer(jax.jit(lambda t: pallas_option_a_shortcut(t, planes)))
    out = jax.block_until_ready(layer(x))

    # Pure-JAX reference of the PyTorch lambda:
    #   F.pad(x[:, :, ::2, ::2], (0,0,0,0, planes//4, planes//4))
    pad = planes // 4
    ref = jnp.pad(x[:, :, ::2, ::2],
                  ((0, 0), (pad, pad), (0, 0), (0, 0)))

    assert out.shape == ref.shape == (N, C + 2 * pad, (H + 1) // 2, (W + 1) // 2), out.shape
    assert out.dtype == x.dtype
    assert bool(jnp.all(out == ref))    # pure data movement -> bit-exact

    print("KERNEL_OK")
</pallas_src>

<mosaic_0001>
module attributes {stable_mosaic.version = 11 : i64} {
  func.func @_pad_channels_kernel(%arg0: i32, %arg1: memref<2x4x64xf32, #tpu.memory_space<vmem>>, %arg2: memref<2x8x64xf32, #tpu.memory_space<vmem>>) attributes {dimension_semantics = [#tpu.dimension_semantics<parallel>], iteration_bounds = array<i64: 1>, scalar_prefetch = 0 : i64, scratch_operands = 0 : i64, tpu.core_type = #tpu.core_type<tc>, window_params = [{transform_indices = @transform_0, window_bounds = array<i64: 2, 4, 64>}, {transform_indices = @transform_1, window_bounds = array<i64: 2, 8, 64>}]} {
    %c0 = arith.constant 0 : index
    %c0_0 = arith.constant 0 : index
    %c0_1 = arith.constant 0 : index
    %0 = vector.load %arg1[%c0, %c0_0, %c0_1] : memref<2x4x64xf32, #tpu.memory_space<vmem>>, vector<2x4x64xf32>
    %cst = arith.constant 0.000000e+00 : f32
    %1 = vector.broadcast %cst : f32 to vector<2x2x64xf32>
    %c0_2 = arith.constant 0 : index
    %c0_3 = arith.constant 0 : index
    %c0_4 = arith.constant 0 : index
    %2 = vector.load %arg2[%c0_2, %c0_3, %c0_4] : memref<2x8x64xf32, #tpu.memory_space<vmem>>, vector<2x2x64xf32>
    tpu.vector_store %arg2[%c0_2, %c0_3, %c0_4], %1 {strides = array<i32>} : memref<2x8x64xf32, #tpu.memory_space<vmem>>, vector<2x2x64xf32>,
    %c0_5 = arith.constant 0 : index
    %c2 = arith.constant 2 : index
    %c0_6 = arith.constant 0 : index
    %3 = vector.load %arg2[%c0_5, %c2, %c0_6] : memref<2x8x64xf32, #tpu.memory_space<vmem>>, vector<2x4x64xf32>
    tpu.vector_store %arg2[%c0_5, %c2, %c0_6], %0 {strides = array<i32>} : memref<2x8x64xf32, #tpu.memory_space<vmem>>, vector<2x4x64xf32>,
    %c0_7 = arith.constant 0 : index
    %c6 = arith.constant 6 : index
    %c0_8 = arith.constant 0 : index
    %4 = vector.load %arg2[%c0_7, %c6, %c0_8] : memref<2x8x64xf32, #tpu.memory_space<vmem>>, vector<2x2x64xf32>
    tpu.vector_store %arg2[%c0_7, %c6, %c0_8], %1 {strides = array<i32>} : memref<2x8x64xf32, #tpu.memory_space<vmem>>, vector<2x2x64xf32>,
    return
  }
  func.func @transform_0(%arg0: i32) -> (i32, i32, i32) {
    %c0_i32 = arith.constant 0 : i32
    %c0_i32_0 = arith.constant 0 : i32
    %c0_i32_1 = arith.constant 0 : i32
    return %arg0, %c0_i32, %c0_i32_0 : i32, i32, i32
  }
  func.func @transform_1(%arg0: i32) -> (i32, i32, i32) {
    %c0_i32 = arith.constant 0 : i32
    %c0_i32_0 = arith.constant 0 : i32
    %c0_i32_1 = arith.constant 0 : i32
    return %arg0, %c0_i32, %c0_i32_0 : i32, i32, i32
  }
}

</mosaic_0001>

<bundles_post_ra>
// kernel: _lambda_.1
= control target key start
LH: loop header
LB: loop body
LE: loop exit
PB: predicated region body
PF: predicated region fallthrough
CT: control target
= control target key end

     0   :  { %vm10_vm0 = vcmask 517120   ;;  %vm13_vm1 = vcmask 519168   ;;  %v23_v0 = vmov 0.0   ;;  %s58_s1 = inlined_call_operand.vmem [shape: f32[2,8,64], index: 1, kind: output, shape index: {}]   ;;  %s59_s0 = inlined_call_operand.vmem [shape: f32[2,4,64], index: 0, kind: input, shape index: {}]  }
   0x1   :  { %11 = vst.msk [vmem:[%s58_s1] sm:$0x3] %vm10_vm0, %v23_v0  ;;  %12 = vst.msk [vmem:[%s58_s1 + $0x8] sm:$0x3] %vm10_vm0, %v23_v0  ;;  %v8_v1 = vld [vmem:[%s59_s0] sm:$0xf] }
   0x2   :  { %16 = vst.msk [vmem:[%s58_s1 + $0x6] sm:$0x3] %vm10_vm0, %v23_v0  ;;  %17 = vst.msk [vmem:[%s58_s1 + $0xe] sm:$0x3] %vm10_vm0, %v23_v0  ;;  %v9_v2 = vld [vmem:[%s59_s0 + $0x4] sm:$0xf] }
   0x3   :  { %14 = vst.msk [vmem:[%s58_s1 + $0x2] sm:$0xf] %vm13_vm1, %v8_v1  ;;  %15 = vst.msk [vmem:[%s58_s1 + $0xa] sm:$0xf] %vm13_vm1, %v9_v2 }

</bundles_post_ra>
